<compile_context>
chip_gen: v7x
topology: tpu7x:2x2x1
jax: 0.10.0
libtpu: 0.0.40
codegen_flags: <defaults>
</compile_context>

<pallas_src>
import jax
import jax.numpy as jnp
from jax.experimental import pallas as pl
from jax.experimental.pallas import tpu as pltpu


def _noise_injection_kernel(x_ref, n_ref, w0_ref, b0_ref, w1_ref, b1_ref,
                            ws_ref, o_ref):
    # x_ref: (TB, C, TS)   n_ref: (TB, 1, TS)
    # w0: (FH, 1)  b0: (FH, 1)  w1: (C, FH)  b1: (C, 1)  ws: (C, 1)
    fh = w0_ref.shape[0]

    n = n_ref[...].astype(jnp.float32)                      # (TB, 1, TS)

    # Learned shortcut (Linear(1, C, bias=False)) + fc1 bias: pure VPU
    # broadcasts -- no MXU for a K=1 contraction.
    ws = ws_ref[...].astype(jnp.float32)[None]              # (1, C, 1)
    b1 = b1_ref[...].astype(jnp.float32)[None]              # (1, C, 1)
    y = ws * n + b1                                          # (TB, C, TS)

    # fc0 (Linear(1, FH)) is also a K=1 outer product -> VPU broadcast.
    w0 = w0_ref[...].astype(jnp.float32)[None]              # (1, FH, 1)
    b0 = b0_ref[...].astype(jnp.float32)[None]              # (1, FH, 1)
    h = w0 * n + b0                                          # (TB, FH, TS)
    h = jnp.maximum(h, 0.2 * h)                              # LeakyReLU(0.2)

    if fh >= 128:
        # Real contraction: worth the MXU.
        w1 = w1_ref[...].astype(jnp.float32)
        y = y + jnp.einsum("cf,bfs->bcs", w1, h,
                           preferred_element_type=jnp.float32)
    else:
        # Tiny FH: unrolled VPU FMA over the hidden axis.
        for f in range(fh):
            w1_f = w1_ref[:, f:f + 1].astype(jnp.float32)[None]   # (1, C, 1)
            y = y + w1_f * h[:, f:f + 1, :]                        # (TB, C, TS)

    # Final add in the output dtype (keeps bf16 paths bf16 on v6e/v7x).
    o_ref[...] = (x_ref[...] + y.astype(o_ref.dtype)).astype(o_ref.dtype)


def init_noise_injection_params(fin, key, dtype=jnp.float32):
    """Deterministic params for LinearResidualBlock(1, fin), PyTorch-Linear-style init."""
    fh = fin
    k0, k1, k2, k3, k4 = jax.random.split(key, 5)

    def unif(k, shape, fan_in):
        bound = 1.0 / (fan_in ** 0.5)
        return jax.random.uniform(k, shape, dtype, -bound, bound)

    w0 = unif(k0, (fh, 1), 1)      # fc0 weight  (Linear(1, fh))
    b0 = unif(k1, (fh, 1), 1)      # fc0 bias
    w1 = unif(k2, (fin, fh), fh)   # fc1 weight  (Linear(fh, fin))
    b1 = unif(k3, (fin, 1), fh)    # fc1 bias
    ws = unif(k4, (fin, 1), 1)     # shortcut weight (Linear(1, fin, bias=False))
    return (w0, b0, w1, b1, ws)


def _pick_spatial_tile(S, max_ts=2048):
    """Largest multiple of 128 that divides S and is <= max_ts; else full S."""
    if S % 128 != 0:
        return S
    ts = 128
    t = 128
    while t <= min(S, max_ts):
        if S % t == 0:
            ts = t
        t += 128
    return ts


def _pick_batch_tile(B, C, TS, itemsize, budget=2 << 20):
    """Largest divisor of B keeping one x tile under ~2 MiB (double-buffer friendly)."""
    tb = 1
    for cand in range(1, B + 1):
        if B % cand == 0 and cand * C * TS * itemsize <= budget:
            tb = cand
    return tb


def noise_injection(x, params, noise=None, *, key=None):
    """x: (B, C) or (B, C, *spatial)  (NCHW for images); noise: (B, *spatial, 1) or None."""
    squeeze_x = False
    if x.ndim == 2:
        x = x[:, :, None]
        squeeze_x = True
    B, C = x.shape[0], x.shape[1]
    sp = x.shape[2:]
    S = 1
    for s in sp:
        S *= int(s)

    if noise is None:
        assert key is not None, "noise_injection: need `key` when noise is None"
        noise = jax.random.normal(key, (B,) + sp + (1,), dtype=x.dtype)

    x_flat = x.reshape(B, C, S)
    # Last dim of noise is 1 -> pure relabeling, no transpose copy.
    n_flat = noise.reshape(B, 1, S)

    w0, b0, w1, b1, ws = params
    fh = w0.shape[0]

    itemsize = jnp.dtype(x.dtype).itemsize
    TS = _pick_spatial_tile(S)
    TB = _pick_batch_tile(B, C, TS, itemsize)
    grid = (B // TB, S // TS)

    param_bytes = sum(int(p.size) * jnp.dtype(p.dtype).itemsize
                      for p in (w0, b0, w1, b1, ws))
    cost = pl.CostEstimate(
        flops=int(B * S * (4 * fh + 2 * fh * C + 2 * C)),
        transcendentals=0,
        bytes_accessed=int(2 * B * C * S * itemsize + B * S * itemsize
                           + param_bytes),
    )

    out = pl.pallas_call(
        _noise_injection_kernel,
        out_shape=jax.ShapeDtypeStruct((B, C, S), x.dtype),
        grid_spec=pl.GridSpec(
            grid=grid,
            in_specs=[
                pl.BlockSpec((TB, C, TS), lambda b, s: (b, 0, s)),   # x slab
                pl.BlockSpec((TB, 1, TS), lambda b, s: (b, 0, s)),   # noise slab
                pl.BlockSpec((fh, 1), lambda b, s: (0, 0)),          # w0
                pl.BlockSpec((fh, 1), lambda b, s: (0, 0)),          # b0
                pl.BlockSpec((C, fh), lambda b, s: (0, 0)),          # w1
                pl.BlockSpec((C, 1), lambda b, s: (0, 0)),           # b1
                pl.BlockSpec((C, 1), lambda b, s: (0, 0)),           # ws
            ],
            out_specs=pl.BlockSpec((TB, C, TS), lambda b, s: (b, 0, s)),
        ),
        compiler_params=pltpu.CompilerParams(
            dimension_semantics=("parallel", "parallel")),
        cost_estimate=cost,
    )(x_flat, n_flat, w0, b0, w1, b1, ws)

    out = out.reshape((B, C) + sp)
    if squeeze_x:
        out = out[:, :, 0]
    return out


def _reference(x, params, noise):
    """Pure-JAX reference mirroring the PyTorch forward."""
    w0, b0, w1, b1, ws = params
    B, C = x.shape[0], x.shape[1]
    sp = x.shape[2:]
    n = noise.reshape(B, -1, 1)                               # (B, S, 1)
    h = n @ w0.T + b0[:, 0]                                   # (B, S, FH)
    h = jnp.where(h > 0, h, 0.2 * h)
    y = n @ ws.T + h @ w1.T + b1[:, 0]                        # (B, S, C)
    y = jnp.transpose(y, (0, 2, 1)).reshape((B, C) + sp)      # permute -> NCHW
    return x + y


if __name__ == "__main__":
    fin = 4
    B, H, W = 2, 16, 16

    root = jax.random.PRNGKey(0)
    kx, kn, kp = jax.random.split(root, 3)

    x = jax.random.normal(kx, (B, fin, H, W), dtype=jnp.float32)
    noise = jax.random.normal(kn, (B, H, W, 1), dtype=jnp.float32)
    params = init_noise_injection_params(fin, kp)

    out = noise_injection(x, params, noise)
    out = jax.block_until_ready(out)

    ref = _reference(x, params, noise)
    assert out.shape == (B, fin, H, W)
    assert jnp.allclose(out, ref, atol=1e-5, rtol=1e-5), "mismatch vs reference"

    print("KERNEL_OK")
</pallas_src>

<mosaic_0001>
module attributes {stable_mosaic.version = 11 : i64} {
  func.func @_noise_injection_kernel(%arg0: i32, %arg1: i32, %arg2: memref<2x4x256xf32, #tpu.memory_space<vmem>>, %arg3: memref<2x1x256xf32, #tpu.memory_space<vmem>>, %arg4: memref<4x1xf32, #tpu.memory_space<vmem>>, %arg5: memref<4x1xf32, #tpu.memory_space<vmem>>, %arg6: memref<4x4xf32, #tpu.memory_space<vmem>>, %arg7: memref<4x1xf32, #tpu.memory_space<vmem>>, %arg8: memref<4x1xf32, #tpu.memory_space<vmem>>, %arg9: memref<2x4x256xf32, #tpu.memory_space<vmem>>) attributes {dimension_semantics = [#tpu.dimension_semantics<parallel>, #tpu.dimension_semantics<parallel>], iteration_bounds = array<i64: 1, 1>, scalar_prefetch = 0 : i64, scratch_operands = 0 : i64, tpu.core_type = #tpu.core_type<tc>, window_params = [{transform_indices = @transform_0, window_bounds = array<i64: 2, 4, 256>}, {transform_indices = @transform_1, window_bounds = array<i64: 2, 1, 256>}, {pipeline_mode = #tpu.pipeline_mode<synchronous>, transform_indices = @transform_2, window_bounds = array<i64: 4, 1>}, {pipeline_mode = #tpu.pipeline_mode<synchronous>, transform_indices = @transform_3, window_bounds = array<i64: 4, 1>}, {pipeline_mode = #tpu.pipeline_mode<synchronous>, transform_indices = @transform_4, window_bounds = array<i64: 4, 4>}, {pipeline_mode = #tpu.pipeline_mode<synchronous>, transform_indices = @transform_5, window_bounds = array<i64: 4, 1>}, {pipeline_mode = #tpu.pipeline_mode<synchronous>, transform_indices = @transform_6, window_bounds = array<i64: 4, 1>}, {transform_indices = @transform_7, window_bounds = array<i64: 2, 4, 256>}]} {
    %c0 = arith.constant 0 : index
    %c0_0 = arith.constant 0 : index
    %c0_1 = arith.constant 0 : index
    %0 = vector.load %arg3[%c0, %c0_0, %c0_1] : memref<2x1x256xf32, #tpu.memory_space<vmem>>, vector<2x1x256xf32>
    %c0_2 = arith.constant 0 : index
    %c0_3 = arith.constant 0 : index
    %1 = vector.load %arg8[%c0_2, %c0_3] : memref<4x1xf32, #tpu.memory_space<vmem>>, vector<4x1xf32>
    %2 = vector.shape_cast %1 : vector<4x1xf32> to vector<1x4x1xf32>
    %c0_4 = arith.constant 0 : index
    %c0_5 = arith.constant 0 : index
    %3 = vector.load %arg7[%c0_4, %c0_5] : memref<4x1xf32, #tpu.memory_space<vmem>>, vector<4x1xf32>
    %4 = vector.shape_cast %3 : vector<4x1xf32> to vector<1x4x1xf32>
    %5 = vector.broadcast %2 : vector<1x4x1xf32> to vector<2x4x256xf32>
    %6 = vector.broadcast %0 : vector<2x1x256xf32> to vector<2x4x256xf32>
    %7 = arith.mulf %5, %6 : vector<2x4x256xf32>
    %8 = vector.broadcast %4 : vector<1x4x1xf32> to vector<2x4x256xf32>
    %9 = arith.addf %7, %8 : vector<2x4x256xf32>
    %c0_6 = arith.constant 0 : index
    %c0_7 = arith.constant 0 : index
    %10 = vector.load %arg4[%c0_6, %c0_7] : memref<4x1xf32, #tpu.memory_space<vmem>>, vector<4x1xf32>
    %11 = vector.shape_cast %10 : vector<4x1xf32> to vector<1x4x1xf32>
    %c0_8 = arith.constant 0 : index
    %c0_9 = arith.constant 0 : index
    %12 = vector.load %arg5[%c0_8, %c0_9] : memref<4x1xf32, #tpu.memory_space<vmem>>, vector<4x1xf32>
    %13 = vector.shape_cast %12 : vector<4x1xf32> to vector<1x4x1xf32>
    %14 = vector.broadcast %11 : vector<1x4x1xf32> to vector<2x4x256xf32>
    %15 = vector.broadcast %0 : vector<2x1x256xf32> to vector<2x4x256xf32>
    %16 = arith.mulf %14, %15 : vector<2x4x256xf32>
    %17 = vector.broadcast %13 : vector<1x4x1xf32> to vector<2x4x256xf32>
    %18 = arith.addf %16, %17 : vector<2x4x256xf32>
    %cst = arith.constant 2.000000e-01 : f32
    %19 = vector.broadcast %cst : f32 to vector<2x4x256xf32>
    %20 = arith.mulf %19, %18 : vector<2x4x256xf32>
    %21 = arith.maximumf %18, %20 : vector<2x4x256xf32>
    %c0_10 = arith.constant 0 : index
    %c0_11 = arith.constant 0 : index
    %22 = vector.load %arg6[%c0_10, %c0_11] : memref<4x4xf32, #tpu.memory_space<vmem>>, vector<4x1xf32>
    %23 = vector.shape_cast %22 : vector<4x1xf32> to vector<1x4x1xf32>
    %24 = vector.extract_strided_slice %21 {offsets = [0, 0, 0], sizes = [2, 1, 256], strides = [1, 1, 1]} : vector<2x4x256xf32> to vector<2x1x256xf32>
    %25 = vector.broadcast %23 : vector<1x4x1xf32> to vector<2x4x256xf32>
    %26 = vector.broadcast %24 : vector<2x1x256xf32> to vector<2x4x256xf32>
    %27 = arith.mulf %25, %26 : vector<2x4x256xf32>
    %28 = arith.addf %9, %27 : vector<2x4x256xf32>
    %c0_12 = arith.constant 0 : index
    %c1 = arith.constant 1 : index
    %29 = vector.load %arg6[%c0_12, %c1] : memref<4x4xf32, #tpu.memory_space<vmem>>, vector<4x1xf32>
    %30 = vector.shape_cast %29 : vector<4x1xf32> to vector<1x4x1xf32>
    %31 = vector.extract_strided_slice %21 {offsets = [0, 1, 0], sizes = [2, 1, 256], strides = [1, 1, 1]} : vector<2x4x256xf32> to vector<2x1x256xf32>
    %32 = vector.broadcast %30 : vector<1x4x1xf32> to vector<2x4x256xf32>
    %33 = vector.broadcast %31 : vector<2x1x256xf32> to vector<2x4x256xf32>
    %34 = arith.mulf %32, %33 : vector<2x4x256xf32>
    %35 = arith.addf %28, %34 : vector<2x4x256xf32>
    %c0_13 = arith.constant 0 : index
    %c2 = arith.constant 2 : index
    %36 = vector.load %arg6[%c0_13, %c2] : memref<4x4xf32, #tpu.memory_space<vmem>>, vector<4x1xf32>
    %37 = vector.shape_cast %36 : vector<4x1xf32> to vector<1x4x1xf32>
    %38 = vector.extract_strided_slice %21 {offsets = [0, 2, 0], sizes = [2, 1, 256], strides = [1, 1, 1]} : vector<2x4x256xf32> to vector<2x1x256xf32>
    %39 = vector.broadcast %37 : vector<1x4x1xf32> to vector<2x4x256xf32>
    %40 = vector.broadcast %38 : vector<2x1x256xf32> to vector<2x4x256xf32>
    %41 = arith.mulf %39, %40 : vector<2x4x256xf32>
    %42 = arith.addf %35, %41 : vector<2x4x256xf32>
    %c0_14 = arith.constant 0 : index
    %c3 = arith.constant 3 : index
    %43 = vector.load %arg6[%c0_14, %c3] : memref<4x4xf32, #tpu.memory_space<vmem>>, vector<4x1xf32>
    %44 = vector.shape_cast %43 : vector<4x1xf32> to vector<1x4x1xf32>
    %45 = vector.extract_strided_slice %21 {offsets = [0, 3, 0], sizes = [2, 1, 256], strides = [1, 1, 1]} : vector<2x4x256xf32> to vector<2x1x256xf32>
    %46 = vector.broadcast %44 : vector<1x4x1xf32> to vector<2x4x256xf32>
    %47 = vector.broadcast %45 : vector<2x1x256xf32> to vector<2x4x256xf32>
    %48 = arith.mulf %46, %47 : vector<2x4x256xf32>
    %49 = arith.addf %42, %48 : vector<2x4x256xf32>
    %c0_15 = arith.constant 0 : index
    %c0_16 = arith.constant 0 : index
    %c0_17 = arith.constant 0 : index
    %50 = vector.load %arg2[%c0_15, %c0_16, %c0_17] : memref<2x4x256xf32, #tpu.memory_space<vmem>>, vector<2x4x256xf32>
    %51 = arith.addf %50, %49 : vector<2x4x256xf32>
    %c0_18 = arith.constant 0 : index
    %c0_19 = arith.constant 0 : index
    %c0_20 = arith.constant 0 : index
    %52 = vector.load %arg9[%c0_18, %c0_19, %c0_20] : memref<2x4x256xf32, #tpu.memory_space<vmem>>, vector<2x4x256xf32>
    tpu.vector_store %arg9[%c0_18, %c0_19, %c0_20], %51 {strides = array<i32>} : memref<2x4x256xf32, #tpu.memory_space<vmem>>, vector<2x4x256xf32>,
    return
  }
  func.func @transform_0(%arg0: i32, %arg1: i32) -> (i32, i32, i32) {
    %c0_i32 = arith.constant 0 : i32
    %c0_i32_0 = arith.constant 0 : i32
    return %arg0, %c0_i32, %arg1 : i32, i32, i32
  }
  func.func @transform_1(%arg0: i32, %arg1: i32) -> (i32, i32, i32) {
    %c0_i32 = arith.constant 0 : i32
    %c0_i32_0 = arith.constant 0 : i32
    return %arg0, %c0_i32, %arg1 : i32, i32, i32
  }
  func.func @transform_2(%arg0: i32, %arg1: i32) -> (i32, i32) {
    %c0_i32 = arith.constant 0 : i32
    %c0_i32_0 = arith.constant 0 : i32
    %c0_i32_1 = arith.constant 0 : i32
    return %c0_i32, %c0_i32_0 : i32, i32
  }
  func.func @transform_3(%arg0: i32, %arg1: i32) -> (i32, i32) {
    %c0_i32 = arith.constant 0 : i32
    %c0_i32_0 = arith.constant 0 : i32
    %c0_i32_1 = arith.constant 0 : i32
    return %c0_i32, %c0_i32_0 : i32, i32
  }
  func.func @transform_4(%arg0: i32, %arg1: i32) -> (i32, i32) {
    %c0_i32 = arith.constant 0 : i32
    %c0_i32_0 = arith.constant 0 : i32
    %c0_i32_1 = arith.constant 0 : i32
    return %c0_i32, %c0_i32_0 : i32, i32
  }
  func.func @transform_5(%arg0: i32, %arg1: i32) -> (i32, i32) {
    %c0_i32 = arith.constant 0 : i32
    %c0_i32_0 = arith.constant 0 : i32
    %c0_i32_1 = arith.constant 0 : i32
    return %c0_i32, %c0_i32_0 : i32, i32
  }
  func.func @transform_6(%arg0: i32, %arg1: i32) -> (i32, i32) {
    %c0_i32 = arith.constant 0 : i32
    %c0_i32_0 = arith.constant 0 : i32
    %c0_i32_1 = arith.constant 0 : i32
    return %c0_i32, %c0_i32_0 : i32, i32
  }
  func.func @transform_7(%arg0: i32, %arg1: i32) -> (i32, i32, i32) {
    %c0_i32 = arith.constant 0 : i32
    %c0_i32_0 = arith.constant 0 : i32
    return %arg0, %c0_i32, %arg1 : i32, i32, i32
  }
}

</mosaic_0001>

<bundles_post_ra>
// kernel: tpu_custom_call.1
= control target key start
LH: loop header
LB: loop body
LE: loop exit
PB: predicated region body
PF: predicated region fallthrough
CT: control target
= control target key end

     0   :  { %v280_v2 = vmov 0   ;;  %s366_s0 = inlined_call_operand.vmem [shape: f32[2,4,256], index: 0, kind: input, shape index: {}]   ;;  %s367_s1 = inlined_call_operand.vmem [shape: f32[2,1,256], index: 1, kind: input, shape index: {}]   ;;  %s368_s2 = inlined_call_operand.vmem [shape: f32[4,1], index: 2, kind: input, shape index: {}]   ;;  %s369_s3 = inlined_call_operand.vmem [shape: f32[4,1], index: 3, kind: input, shape index: {}]   ;;  %s370_s4 = inlined_call_operand.vmem [shape: f32[4,4], index: 4, kind: input, shape index: {}]   ;;  %s371_s5 = inlined_call_operand.vmem [shape: f32[4,1], index: 5, kind: input, shape index: {}]   ;;  %s372_s6 = inlined_call_operand.vmem [shape: f32[4,1], index: 6, kind: input, shape index: {}]   ;;  %s373_s7 = inlined_call_operand.hbm [shape: f32[2,4,256], index: 7, kind: output, shape index: {}]  }
   0x1   :  { %v71_v0 = vld [vmem:[%s368_s2] sm:$0xf]  ;;  %251 = vset.pattern.permute.xlu1 %v280_v2  ;;  %250 = vset.pattern.permute.xlu0 %v280_v2 }
   0x2   :  { %v29_v1 = vld [vmem:[%s372_s6] sm:$0xf]  ;;  %75 = vperm.xlu0 %250, %v71_v0  }
   0x3   :  { %33 = vperm.xlu1 %251, %v29_v1   ;;  %v72_v3 = vld [vmem:[%s369_s3] sm:$0xf] }
   0x4   :  { %v30_v4 = vld [vmem:[%s371_s5] sm:$0xf] }
   0x5   :  { %12 = vsyncpa [#allocation3], 0  ;;  %v99_v5 = vld [vmem:[%s370_s4] sm:$0xf]  ;;  %v281_v6 = vmov 1   ;;  %v282_v7 = vmov 2   ;;  %v38_v9 = vlaneseq }
   0x6   :  { %84 = vperm.xlu0 %250, %v72_v3   ;;  %v283_v8 = vmov 3   ;;  %v27_v13 = vld [vmem:[%s367_s1] sm:$0x3]  ;;  %v28_v14 = vld [vmem:[%s367_s1 + $0x2] sm:$0x3]  ;;  %s284_s13 = smov [#allocation2]  }
   0x7   :  { %64 = vperm.xlu1 %251, %v30_v4   ;;  %v39_v10 = vshrl.u32 %v38_v9, 7  ;;  %s232_s14 = sshll.u32 %s284_s13, 4  ;;  %s233_s14 = int_to_ptr.vmem [resolvable:$true] %s232_s14 }
   0x8   :  { %s256_s15 = scalar_lea.vmem %s233_s14, 256  ;;  %p261_p1 = scmp.lt.s32.totalorder %s233_s14, %s233_s14 }
   0x9   :  { %v40_v11 = vsub.s32 0, %v39_v10  ;;  %v44_v12 = vsub.s32 1, %v39_v10  ;;  %v163_v40 = vsub.s32 2, %v39_v10  ;;  %v191_v41 = vsub.s32 3, %v39_v10  ;;  %p257_p0 = scmp.ne.s32.totalorder %s233_s14, %s256_s15  ;;  %p262_p2 = scmp.lt.s32.totalorder %s256_s15, %s256_s15 }
   0xa   :  { %102 = vperm.xlu0 %250, %v99_v5  }
   0xb   :  { %252 = vset.pattern.permute.xlu1 %v281_v6  ;;  %v41_v15 = vrot.slane %v27_v13, %v40_v11  ;;  %v45_v16 = vrot.slane %v27_v13, %v44_v12  ;;  %v49_v17 = vrot.slane %v28_v14, %v40_v11  ;;  %v53_v18 = vrot.slane %v28_v14, %v44_v12  ;;  %p263_p3 = por %p262_p2, %p261_p1 }
   0xc   :  { %130 = vperm.xlu1 %252, %v99_v5  }
   0xd   :  { %p264_p4 = pnand %p263_p3, %p257_p0 }
   0xe   :  { %253 = vset.pattern.permute.xlu0 %v282_v7 }
   0xf   :  { %158 = vperm.xlu0 %253, %v99_v5  }
  0x10   :  { %254 = vset.pattern.permute.xlu1 %v283_v8 }
  0x11   :  { %186 = vperm.xlu1 %254, %v99_v5  }
  0x13   :  { %255 = vset.pattern.permute.xlu0 %v283_v8 }
  0x81   :  { %v76_v19 = vpop.permute.xlu0 %75 }
  0x82   :  { %v34_v20 = vpop.permute.xlu1 %33  ;;  %v78_v21 = vmul.f32 %v76_v19, %v41_v15  ;;  %v79_v22 = vmul.f32 %v76_v19, %v45_v16  ;;  %v80_v23 = vmul.f32 %v76_v19, %v49_v17  ;;  %v81_v24 = vmul.f32 %v76_v19, %v53_v18 }
  0x83   :  { %v58_v25 = vmul.f32 %v41_v15, %v34_v20  ;;  %v59_v31 = vmul.f32 %v45_v16, %v34_v20  ;;  %v60_v32 = vmul.f32 %v49_v17, %v34_v20  ;;  %v61_v33 = vmul.f32 %v53_v18, %v34_v20 }
  0x85   :  { %v85_v26 = vpop.permute.xlu0 %84 }
  0x86   :  { %v87_v27 = vadd.f32 %v85_v26, %v78_v21  ;;  %v88_v28 = vadd.f32 %v85_v26, %v79_v22  ;;  %v89_v29 = vadd.f32 %v85_v26, %v80_v23  ;;  %v90_v30 = vadd.f32 %v85_v26, %v81_v24  ;;  %v65_v34 = vpop.permute.xlu1 %64 }
  0x87   :  { %v67_v45 = vadd.f32 %v65_v34, %v58_v25  ;;  %v68_v47 = vadd.f32 %v65_v34, %v59_v31  ;;  %v69_v48 = vadd.f32 %v65_v34, %v60_v32  ;;  %v70_v49 = vadd.f32 %v65_v34, %v61_v33 }
  0x88   :  { %v91_v35 = vmul.f32 0.2, %v87_v27  ;;  %v92_v36 = vmul.f32 0.2, %v88_v28  ;;  %v93_v37 = vmul.f32 0.2, %v89_v29 }
  0x89   :  { %v94_v38 = vmul.f32 0.2, %v90_v30  ;;  %v103_v39 = vpop.permute.xlu0 %102 }
  0x8a   :  { %v95_v42 = vmax.f32 %v87_v27, %v91_v35  ;;  %v96_v43 = vmax.f32 %v88_v28, %v92_v36  ;;  %v97_v44 = vmax.f32 %v89_v29, %v93_v37  ;;  %v213_v37 = vld [vmem:[%s366_s0] sm:$0xff] }
  0x8b   :  { %v98_v46 = vmax.f32 %v90_v30, %v94_v38  ;;  %v131_v55 = vpop.permute.xlu1 %130 }
  0x8c   :  { %v108_v50 = vrot.slane %v95_v42, %v40_v11  ;;  %v112_v51 = vrot.slane %v96_v43, %v40_v11  ;;  %v116_v52 = vrot.slane %v97_v44, %v40_v11  ;;  %v136_v53 = vrot.slane %v95_v42, %v44_v12 }
  0x8d   :  { %v120_v54 = vrot.slane %v98_v46, %v40_v11  ;;  %v140_v56 = vrot.slane %v96_v43, %v44_v12  ;;  %v144_v57 = vrot.slane %v97_v44, %v44_v12  ;;  %v148_v58 = vrot.slane %v98_v46, %v44_v12 }
  0x8e   :  { %v121_v59 = vmul.f32 %v108_v50, %v103_v39  ;;  %v122_v60 = vmul.f32 %v112_v51, %v103_v39  ;;  %v123_v61 = vmul.f32 %v116_v52, %v103_v39  ;;  %v149_v62 = vmul.f32 %v136_v53, %v131_v55  ;;  %v159_v3 = vpop.permute.xlu0 %158 }
  0x8f   :  { %v124_v63 = vmul.f32 %v120_v54, %v103_v39  ;;  %v150_v0 = vmul.f32 %v140_v56, %v131_v55  ;;  %v151_v1 = vmul.f32 %v144_v57, %v131_v55  ;;  %v152_v2 = vmul.f32 %v148_v58, %v131_v55  ;;  %v214_v39 = vld [vmem:[%s366_s0 + $0x8] sm:$0xff] }
  0x90   :  { %v125_v4 = vadd.f32 %v121_v59, %v67_v45  ;;  %v126_v5 = vadd.f32 %v122_v60, %v68_v47  ;;  %v127_v6 = vadd.f32 %v123_v61, %v69_v48  ;;  %v164_v7 = vrot.slane %v95_v42, %v163_v40  ;;  %v187_v20 = vpop.permute.xlu1 %186 }
  0x91   :  { %v128_v8 = vadd.f32 %v124_v63, %v70_v49  ;;  %v168_v9 = vrot.slane %v96_v43, %v163_v40  ;;  %v172_v10 = vrot.slane %v97_v44, %v163_v40  ;;  %v176_v11 = vrot.slane %v98_v46, %v163_v40 }
  0x92   :  { %v153_v13 = vadd.f32 %v149_v62, %v125_v4  ;;  %v154_v14 = vadd.f32 %v150_v0, %v126_v5  ;;  %v155_v12 = vadd.f32 %v151_v1, %v127_v6  ;;  %v177_v15 = vmul.f32 %v164_v7, %v159_v3 }
  0x93   :  { %v156_v16 = vadd.f32 %v152_v2, %v128_v8  ;;  %v178_v17 = vmul.f32 %v168_v9, %v159_v3  ;;  %v179_v18 = vmul.f32 %v172_v10, %v159_v3  ;;  %v180_v19 = vmul.f32 %v176_v11, %v159_v3 }
  0x94   :  { %v181_v21 = vadd.f32 %v177_v15, %v153_v13  ;;  %v192_v22 = vrot.slane %v95_v42, %v191_v41  ;;  %v196_v23 = vrot.slane %v96_v43, %v191_v41  ;;  %v200_v24 = vrot.slane %v97_v44, %v191_v41 }
  0x95   :  { %v182_v25 = vadd.f32 %v178_v17, %v154_v14  ;;  %v183_v26 = vadd.f32 %v179_v18, %v155_v12  ;;  %v184_v27 = vadd.f32 %v180_v19, %v156_v16  ;;  %v204_v28 = vrot.slane %v98_v46, %v191_v41 }
  0x96   :  { %v205_v29 = vmul.f32 %v192_v22, %v187_v20  ;;  %v206_v30 = vmul.f32 %v196_v23, %v187_v20  ;;  %v207_v31 = vmul.f32 %v200_v24, %v187_v20 }
  0x97   :  { %v208_v32 = vmul.f32 %v204_v28, %v187_v20 }
  0x98   :  { %v209_v33 = vadd.f32 %v205_v29, %v181_v21  ;;  %v210_v34 = vadd.f32 %v206_v30, %v182_v25  ;;  %v211_v35 = vadd.f32 %v207_v31, %v183_v26 }
  0x99   :  { %v212_v36 = vadd.f32 %v208_v32, %v184_v27 }
  0x9a   :  { %v219_v38 = vcombine.low %v209_v33, %v210_v34 }
  0x9b   :  { %v220_v40 = vcombine.low %v211_v35, %v212_v36 }
  0x9c   :  { %v223_v41 = vadd.f32 %v219_v38, %v213_v37 }
  0x9d   :  { %v224_v42 = vadd.f32 %v220_v40, %v214_v39 }
  0x9e   :  { %225 = vst [vmem:[#allocation2] sm:$0xff] %v223_v41 }
  0x9f   :  { %226 = vst [vmem:[#allocation2 + $0x8] sm:$0xff] %v224_v42 }
  0xa0   :  { %267 = shalt.err (!%p264_p4)
}
  0xa1   :  { %s268_s18 = scalar_lea.hbm %s373_s7, 256 }
  0xa2   :  { %p269_p5 = scmp.ne.s32.totalorder %s373_s7, %s268_s18  ;;  %p272_p6 = scmp.lt.u32.totalorder %s268_s18, %s373_s7 }
  0xa4   :  { %p274_p7 = pnand %p272_p6, %p269_p5 }
  0xa6   :  { %277 = shalt.err (!%p274_p7)
}
  0xa7   :  { %s285_s22 = smov 128   ;;  %s286_s23 = smov 8  }
  0xa8   :  { %238 = dma.vmem_to_hbm [thread:$0]  %s233_s14, 256, %s373_s7, [#allocation3], %s285_s22, %s285_s22, %s286_s23  }
  0xa9   :  { %278 = dma.done.wait [#allocation3], 256  }
  0xaa   :  { %279 = vsyncadd [#allocation3], 4294967040 }
  0xab   :  { %242 = vsyncpa [#allocation3], 1 }

</bundles_post_ra>
